<compile_context>
chip_gen: v5e
topology: v5e:2x2
jax: 0.10.0
libtpu: 0.0.40
codegen_flags: <defaults>
</compile_context>

<pallas_src>
import numpy as np
import jax
import jax.numpy as jnp
from jax.experimental import pallas as pl
from jax.experimental.pallas import tpu as pltpu


def _round_up(n, m):
    return ((n + m - 1) // m) * m


def _choose_batch_tiling(B, tile_b_max=2048, lane=128):
    """Pick (tile_b, B_pad): lane-aligned, balanced tiles, >=2 tiles when batch allows."""
    B_lane = _round_up(max(B, 1), lane)
    n_tiles = max(1, -(-B_lane // tile_b_max))           # ceil div
    if n_tiles == 1 and B_lane >= 2 * lane:
        n_tiles = 2                                       # v7x: give both TCs a grid step
    tile_b = _round_up(-(-B_lane // n_tiles), lane)
    n_tiles = -(-B_lane // tile_b)
    return tile_b, tile_b * n_tiles


# ----------------------------------------------------------------------------
# Pallas kernel: one batch tile (batch on lanes), all f32
# ----------------------------------------------------------------------------
def pgdnlcv_kernel(x_ref, t_ref,
                   w1_ref, b1_ref,
                   w2_ref, b2_ref,
                   w3_ref,
                   k_ref, u0_ref,
                   o_ref):
    x = x_ref[...]                                                    # (n_in, tb) f32

    # --- MLP branch (b3 cancels against the precomputed target branch) ---
    h1 = jnp.tanh(jnp.dot(w1_ref[...], x,
                          preferred_element_type=jnp.float32) + b1_ref[...])   # (n_hid, tb)
    h2 = jnp.tanh(jnp.dot(w2_ref[...], h1,
                          preferred_element_type=jnp.float32) + b2_ref[...])   # (n_hid, tb)
    u = jnp.dot(w3_ref[...], h2, preferred_element_type=jnp.float32)           # (n_out, tb)
    out = jnp.abs(u - u0_ref[...])                                    # u0 = W3 @ h2(target)

    # --- reg branch: || K @ (x - target) ||_1 per column, K = eps + W^T W (symmetric) ---
    d = x - t_ref[...]                                                # (n_in, tb)
    dk = jnp.dot(k_ref[...], d, preferred_element_type=jnp.float32)   # (n_in, tb)
    reg = jnp.sum(jnp.abs(dk), axis=0, keepdims=True)                 # (1, tb)

    o_ref[...] = out + reg                                            # (n_out, tb)


# ----------------------------------------------------------------------------
# Wrapper: parameter prep + batch-tiled pallas_call
# ----------------------------------------------------------------------------
def pgdnlcv_forward(x, params, *, tile_b_max=2048):
    B, n_input = x.shape
    f32 = jnp.float32
    hi = jax.lax.Precision.HIGHEST

    w1 = params["w1"].astype(f32)                       # (n_hid, n_in)
    b1 = params["b1"].reshape(-1, 1).astype(f32)        # (n_hid, 1)
    w2 = params["w2"].astype(f32)                       # (n_hid, n_hid)
    b2 = params["b2"].reshape(-1, 1).astype(f32)        # (n_hid, 1)
    w3 = params["w3"].astype(f32)                       # (n_out, n_hid)
    w_reg = params["w_reg"].astype(f32)                 # (n_out, n_in)
    t_col = params["target"].reshape(-1, 1).astype(f32)  # (n_in, 1)
    n_output = w3.shape[0]

    # reg matrix K = eps + W^T W  (symmetric -> K @ d^T == ((x - t) @ K)^T)
    K = params["eps"] + jnp.dot(w_reg.T, w_reg, precision=hi)          # (n_in, n_in)

    # Constant target branch of the MLP: computed ONCE per call (b3 folded out entirely).
    h1t = jnp.tanh(jnp.dot(w1, t_col, precision=hi) + b1)
    h2t = jnp.tanh(jnp.dot(w2, h1t, precision=hi) + b2)
    u0 = jnp.dot(w3, h2t, precision=hi)                                # (n_out, 1)

    # Batch tiling: batch on the lane axis.
    tile_b, B_pad = _choose_batch_tiling(B, tile_b_max)
    x_t = jnp.pad(x.astype(f32).T, ((0, 0), (0, B_pad - B)))           # (n_in, B_pad)

    grid = (B_pad // tile_b,)
    tiled = lambda rows: pl.BlockSpec((rows, tile_b), lambda i: (0, i))
    resident = lambda arr: pl.BlockSpec(arr.shape, lambda i: (0, 0))

    args = (x_t, t_col, w1, b1, w2, b2, w3, K, u0)

    out_t = pl.pallas_call(
        pgdnlcv_kernel,
        out_shape=jax.ShapeDtypeStruct((n_output, B_pad), f32),
        grid=grid,
        in_specs=[tiled(n_input)] + [resident(a) for a in args[1:]],
        out_specs=tiled(n_output),
        compiler_params=pltpu.CompilerParams(
            dimension_semantics=("parallel",),
            vmem_limit_bytes=32 * 1024 * 1024),
    )(*args)

    return out_t[:, :B].T                                              # (B, n_out)


# ----------------------------------------------------------------------------
# Parameter init (PyTorch-style uniform(+-1/sqrt(fan_in)) Linear init, torch orientation)
# ----------------------------------------------------------------------------
def init_params(key, n_input, n_hidden, n_output, eps):
    ks = jax.random.split(key, 8)

    def linear(kw, kb, fan_in, fan_out):
        bound = 1.0 / np.sqrt(fan_in)
        w = jax.random.uniform(kw, (fan_out, fan_in), jnp.float32, -bound, bound)
        b = jax.random.uniform(kb, (fan_out,), jnp.float32, -bound, bound)
        return w, b

    w1, b1 = linear(ks[0], ks[1], n_input, n_hidden)
    w2, b2 = linear(ks[2], ks[3], n_hidden, n_hidden)
    w3, b3 = linear(ks[4], ks[5], n_hidden, n_output)
    bound = 1.0 / np.sqrt(n_input)
    w_reg = jax.random.uniform(ks[6], (n_output, n_input), jnp.float32, -bound, bound)
    # TODO(synk): real module loads the target vector from './data/target_100.npy'; synthesized here.
    target = jax.random.normal(ks[7], (1, n_input), jnp.float32)
    return dict(w1=w1, b1=b1, w2=w2, b2=b2, w3=w3, b3=b3,
                w_reg=w_reg, eps=eps, target=target)


# ----------------------------------------------------------------------------
# Reference: PyTorch-spec semantics in float64 (numpy, exact)
# ----------------------------------------------------------------------------
def reference_forward_np(x, p):
    f = lambda a: np.asarray(a, dtype=np.float64)
    w1, b1 = f(p["w1"]), f(p["b1"])
    w2, b2 = f(p["w2"]), f(p["b2"])
    w3, b3 = f(p["w3"]), f(p["b3"])
    w_reg, target = f(p["w_reg"]), f(p["target"])
    xx = f(x)

    def mlp(v):
        h1 = np.tanh(v @ w1.T + b1)
        h2 = np.tanh(h1 @ w2.T + b2)
        return h2 @ w3.T + b3

    t = np.broadcast_to(target, xx.shape)
    out = mlp(xx) - mlp(t)
    K = p["eps"] + w_reg.T @ w_reg
    reg = np.sum(np.abs((xx - t) @ K), axis=1, keepdims=True)
    return np.abs(out) + reg


if __name__ == "__main__":
    n_input, n_hidden, n_output = 8, 32, 4
    eps = 0.1

    key = jax.random.PRNGKey(0)
    kx, kx2, kp = jax.random.split(key, 3)
    params = init_params(kp, n_input, n_hidden, n_output, eps)

    # small batch (single grid step)
    x = jax.random.normal(kx, (2, n_input), jnp.float32)
    out = jax.block_until_ready(pgdnlcv_forward(x, params))
    ref = reference_forward_np(np.asarray(x), params)
    np.testing.assert_allclose(np.asarray(out), ref.astype(np.float32),
                               rtol=2e-3, atol=2e-3)

    # larger batch (exercises multi-tile grid + batch padding path)
    x2 = jax.random.normal(kx2, (300, n_input), jnp.float32)
    out2 = jax.block_until_ready(pgdnlcv_forward(x2, params))
    ref2 = reference_forward_np(np.asarray(x2), params)
    np.testing.assert_allclose(np.asarray(out2), ref2.astype(np.float32),
                               rtol=2e-3, atol=2e-3)

    print("KERNEL_OK")
</pallas_src>

<mosaic_0001>
module attributes {stable_mosaic.version = 11 : i64} {
  func.func @pgdnlcv_kernel(%arg0: i32, %arg1: memref<8x128xf32, #tpu.memory_space<vmem>>, %arg2: memref<8x1xf32, #tpu.memory_space<vmem>>, %arg3: memref<32x8xf32, #tpu.memory_space<vmem>>, %arg4: memref<32x1xf32, #tpu.memory_space<vmem>>, %arg5: memref<32x32xf32, #tpu.memory_space<vmem>>, %arg6: memref<32x1xf32, #tpu.memory_space<vmem>>, %arg7: memref<4x32xf32, #tpu.memory_space<vmem>>, %arg8: memref<8x8xf32, #tpu.memory_space<vmem>>, %arg9: memref<4x1xf32, #tpu.memory_space<vmem>>, %arg10: memref<4x128xf32, #tpu.memory_space<vmem>>) attributes {dimension_semantics = [#tpu.dimension_semantics<parallel>], iteration_bounds = array<i64: 1>, scalar_prefetch = 0 : i64, scratch_operands = 0 : i64, tpu.core_type = #tpu.core_type<tc>, window_params = [{transform_indices = @transform_0, window_bounds = array<i64: 8, 128>}, {pipeline_mode = #tpu.pipeline_mode<synchronous>, transform_indices = @transform_1, window_bounds = array<i64: 8, 1>}, {pipeline_mode = #tpu.pipeline_mode<synchronous>, transform_indices = @transform_2, window_bounds = array<i64: 32, 8>}, {pipeline_mode = #tpu.pipeline_mode<synchronous>, transform_indices = @transform_3, window_bounds = array<i64: 32, 1>}, {pipeline_mode = #tpu.pipeline_mode<synchronous>, transform_indices = @transform_4, window_bounds = array<i64: 32, 32>}, {pipeline_mode = #tpu.pipeline_mode<synchronous>, transform_indices = @transform_5, window_bounds = array<i64: 32, 1>}, {pipeline_mode = #tpu.pipeline_mode<synchronous>, transform_indices = @transform_6, window_bounds = array<i64: 4, 32>}, {pipeline_mode = #tpu.pipeline_mode<synchronous>, transform_indices = @transform_7, window_bounds = array<i64: 8, 8>}, {pipeline_mode = #tpu.pipeline_mode<synchronous>, transform_indices = @transform_8, window_bounds = array<i64: 4, 1>}, {transform_indices = @transform_9, window_bounds = array<i64: 4, 128>}]} {
    %c0 = arith.constant 0 : index
    %c0_0 = arith.constant 0 : index
    %0 = vector.load %arg1[%c0, %c0_0] : memref<8x128xf32, #tpu.memory_space<vmem>>, vector<8x128xf32>
    %c0_1 = arith.constant 0 : index
    %c0_2 = arith.constant 0 : index
    %1 = vector.load %arg3[%c0_1, %c0_2] : memref<32x8xf32, #tpu.memory_space<vmem>>, vector<32x8xf32>
    %cst = arith.constant dense<0.000000e+00> : vector<32x128xf32>
    %2 = tpu.matmul %1, %0, %cst {dimension_numbers = #tpu.dot_dimension_numbers<[1], [0], [0], [1], [0, 0, 1, 1], [], []>} : vector<32x8xf32>, vector<8x128xf32>, vector<32x128xf32> -> vector<32x128xf32>
    %c0_3 = arith.constant 0 : index
    %c0_4 = arith.constant 0 : index
    %3 = vector.load %arg4[%c0_3, %c0_4] : memref<32x1xf32, #tpu.memory_space<vmem>>, vector<32x1xf32>
    %4 = vector.broadcast %3 : vector<32x1xf32> to vector<32x128xf32>
    %5 = arith.addf %2, %4 : vector<32x128xf32>
    %6 = math.tanh %5 : vector<32x128xf32>
    %c0_5 = arith.constant 0 : index
    %c0_6 = arith.constant 0 : index
    %7 = vector.load %arg5[%c0_5, %c0_6] : memref<32x32xf32, #tpu.memory_space<vmem>>, vector<32x32xf32>
    %cst_7 = arith.constant dense<0.000000e+00> : vector<32x128xf32>
    %8 = tpu.matmul %7, %6, %cst_7 {dimension_numbers = #tpu.dot_dimension_numbers<[1], [0], [0], [1], [0, 0, 1, 1], [], []>} : vector<32x32xf32>, vector<32x128xf32>, vector<32x128xf32> -> vector<32x128xf32>
    %c0_8 = arith.constant 0 : index
    %c0_9 = arith.constant 0 : index
    %9 = vector.load %arg6[%c0_8, %c0_9] : memref<32x1xf32, #tpu.memory_space<vmem>>, vector<32x1xf32>
    %10 = vector.broadcast %9 : vector<32x1xf32> to vector<32x128xf32>
    %11 = arith.addf %8, %10 : vector<32x128xf32>
    %12 = math.tanh %11 : vector<32x128xf32>
    %c0_10 = arith.constant 0 : index
    %c0_11 = arith.constant 0 : index
    %13 = vector.load %arg7[%c0_10, %c0_11] : memref<4x32xf32, #tpu.memory_space<vmem>>, vector<4x32xf32>
    %cst_12 = arith.constant dense<0.000000e+00> : vector<4x128xf32>
    %14 = tpu.matmul %13, %12, %cst_12 {dimension_numbers = #tpu.dot_dimension_numbers<[1], [0], [0], [1], [0, 0, 1, 1], [], []>} : vector<4x32xf32>, vector<32x128xf32>, vector<4x128xf32> -> vector<4x128xf32>
    %c0_13 = arith.constant 0 : index
    %c0_14 = arith.constant 0 : index
    %15 = vector.load %arg9[%c0_13, %c0_14] : memref<4x1xf32, #tpu.memory_space<vmem>>, vector<4x1xf32>
    %16 = vector.broadcast %15 : vector<4x1xf32> to vector<4x128xf32>
    %17 = arith.subf %14, %16 : vector<4x128xf32>
    %18 = math.absf %17 : vector<4x128xf32>
    %c0_15 = arith.constant 0 : index
    %c0_16 = arith.constant 0 : index
    %19 = vector.load %arg2[%c0_15, %c0_16] : memref<8x1xf32, #tpu.memory_space<vmem>>, vector<8x1xf32>
    %20 = vector.broadcast %19 : vector<8x1xf32> to vector<8x128xf32>
    %21 = arith.subf %0, %20 : vector<8x128xf32>
    %c0_17 = arith.constant 0 : index
    %c0_18 = arith.constant 0 : index
    %22 = vector.load %arg8[%c0_17, %c0_18] : memref<8x8xf32, #tpu.memory_space<vmem>>, vector<8x8xf32>
    %cst_19 = arith.constant dense<0.000000e+00> : vector<8x128xf32>
    %23 = tpu.matmul %22, %21, %cst_19 {dimension_numbers = #tpu.dot_dimension_numbers<[1], [0], [0], [1], [0, 0, 1, 1], [], []>} : vector<8x8xf32>, vector<8x128xf32>, vector<8x128xf32> -> vector<8x128xf32>
    %24 = math.absf %23 : vector<8x128xf32>
    %cst_20 = arith.constant dense<0.000000e+00> : vector<128xf32>
    %25 = vector.multi_reduction <add>, %24, %cst_20 [0] : vector<8x128xf32> to vector<128xf32>
    %26 = vector.shape_cast %25 : vector<128xf32> to vector<1x128xf32>
    %27 = vector.broadcast %26 : vector<1x128xf32> to vector<4x128xf32>
    %28 = arith.addf %18, %27 : vector<4x128xf32>
    %c0_21 = arith.constant 0 : index
    %c0_22 = arith.constant 0 : index
    %29 = vector.load %arg10[%c0_21, %c0_22] : memref<4x128xf32, #tpu.memory_space<vmem>>, vector<4x128xf32>
    tpu.vector_store %arg10[%c0_21, %c0_22], %28 {strides = array<i32>} : memref<4x128xf32, #tpu.memory_space<vmem>>, vector<4x128xf32>,
    return
  }
  func.func @transform_0(%arg0: i32) -> (i32, i32) {
    %c0_i32 = arith.constant 0 : i32
    %c0_i32_0 = arith.constant 0 : i32
    return %c0_i32, %arg0 : i32, i32
  }
  func.func @transform_1(%arg0: i32) -> (i32, i32) {
    %c0_i32 = arith.constant 0 : i32
    %c0_i32_0 = arith.constant 0 : i32
    %c0_i32_1 = arith.constant 0 : i32
    return %c0_i32, %c0_i32_0 : i32, i32
  }
  func.func @transform_2(%arg0: i32) -> (i32, i32) {
    %c0_i32 = arith.constant 0 : i32
    %c0_i32_0 = arith.constant 0 : i32
    %c0_i32_1 = arith.constant 0 : i32
    return %c0_i32, %c0_i32_0 : i32, i32
  }
  func.func @transform_3(%arg0: i32) -> (i32, i32) {
    %c0_i32 = arith.constant 0 : i32
    %c0_i32_0 = arith.constant 0 : i32
    %c0_i32_1 = arith.constant 0 : i32
    return %c0_i32, %c0_i32_0 : i32, i32
  }
  func.func @transform_4(%arg0: i32) -> (i32, i32) {
    %c0_i32 = arith.constant 0 : i32
    %c0_i32_0 = arith.constant 0 : i32
    %c0_i32_1 = arith.constant 0 : i32
    return %c0_i32, %c0_i32_0 : i32, i32
  }
  func.func @transform_5(%arg0: i32) -> (i32, i32) {
    %c0_i32 = arith.constant 0 : i32
    %c0_i32_0 = arith.constant 0 : i32
    %c0_i32_1 = arith.constant 0 : i32
    return %c0_i32, %c0_i32_0 : i32, i32
  }
  func.func @transform_6(%arg0: i32) -> (i32, i32) {
    %c0_i32 = arith.constant 0 : i32
    %c0_i32_0 = arith.constant 0 : i32
    %c0_i32_1 = arith.constant 0 : i32
    return %c0_i32, %c0_i32_0 : i32, i32
  }
  func.func @transform_7(%arg0: i32) -> (i32, i32) {
    %c0_i32 = arith.constant 0 : i32
    %c0_i32_0 = arith.constant 0 : i32
    %c0_i32_1 = arith.constant 0 : i32
    return %c0_i32, %c0_i32_0 : i32, i32
  }
  func.func @transform_8(%arg0: i32) -> (i32, i32) {
    %c0_i32 = arith.constant 0 : i32
    %c0_i32_0 = arith.constant 0 : i32
    %c0_i32_1 = arith.constant 0 : i32
    return %c0_i32, %c0_i32_0 : i32, i32
  }
  func.func @transform_9(%arg0: i32) -> (i32, i32) {
    %c0_i32 = arith.constant 0 : i32
    %c0_i32_0 = arith.constant 0 : i32
    return %c0_i32, %arg0 : i32, i32
  }
}

</mosaic_0001>

<bundles_post_ra>
// kernel: tpu_custom_call.1
= control target key start
LH: loop header
LB: loop body
LE: loop exit
PB: predicated region body
PF: predicated region fallthrough
CT: control target
= control target key end

     0   :  { %vm62_vm0 = vcmask 64512   ;;  %v332_v3 = vmov 0   ;;  %s465_s0 = inlined_call_operand.vmem [shape: f32[8,128], index: 0, kind: input, shape index: {}]   ;;  %s466_s1 = inlined_call_operand.vmem [shape: f32[8,1], index: 1, kind: input, shape index: {}]   ;;  %s467_s2 = inlined_call_operand.vmem [shape: f32[32,8], index: 2, kind: input, shape index: {}]   ;;  %s468_s3 = inlined_call_operand.vmem [shape: f32[32,1], index: 3, kind: input, shape index: {}]   ;;  %s469_s4 = inlined_call_operand.vmem [shape: f32[32,32], index: 4, kind: input, shape index: {}]   ;;  %s470_s5 = inlined_call_operand.vmem [shape: f32[32,1], index: 5, kind: input, shape index: {}]   ;;  %s471_s6 = inlined_call_operand.vmem [shape: f32[4,32], index: 6, kind: input, shape index: {}]   ;;  %s472_s7 = inlined_call_operand.vmem [shape: f32[8,8], index: 7, kind: input, shape index: {}]   ;;  %s473_s8 = inlined_call_operand.vmem [shape: f32[4,1], index: 8, kind: input, shape index: {}]   ;;  %s474_s9 = inlined_call_operand.hbm [shape: f32[4,128], index: 9, kind: output, shape index: {}]  }
   0x1   :  { %v387_v0 = vld [vmem:[%s465_s0] sm:$0xff]  ;;  %v41_v1 = vld [vmem:[%s468_s3 + $0x18] sm:$0xff]  ;;  %287 = vset.pattern.permute.xlu0 %v332_v3  ;;  %v39_v5 = vld [vmem:[%s468_s3 + $0x8] sm:$0xff]  ;;  %288 = vset.pattern.permute.xlu1 %v332_v3 }
   0x2   :  { %v34_v2 = vld [vmem:[%s467_s2] sm:$0xff]  ;;  %90 = vmatpush.msra.mxu0 %v387_v0  ;;  %v37_v4 = vld [vmem:[%s467_s2 + $0x18] sm:$0xff]  ;;  %59 = vperm.xlu0 %287, %v41_v1  }
   0x3   :  { %270 = vmatmul.msk.f32.vlgmr.msra.gmra.mxu0 %vm62_vm0, %v34_v2  ;;  %280 = vmatpush.msra.mxu2 %v387_v0 }
   0x4   :  { %273 = vmatmul.msk.f32.vlgmr.msra.gmra.mxu2 %vm62_vm0, %v37_v4  ;;  %49 = vperm.xlu1 %288, %v39_v5  }
   0x5   :  { %14 = vsyncpa [#allocation3], 0  ;;  %289 = vset.pattern.permute.xlu2 %v332_v3  ;;  %v40_v6 = vld [vmem:[%s468_s3 + $0x10] sm:$0xff]  ;;  %v35_v7 = vld [vmem:[%s467_s2 + $0x8] sm:$0xff]  ;;  %vm136_vm1 = vcmask 261120   ;;  %s333_s21 = smov [#allocation2]  }
   0x6   :  { %v38_v8 = vld [vmem:[%s468_s3] sm:$0xff]  ;;  %v36_v10 = vld [vmem:[%s467_s2 + $0x10] sm:$0xff]  ;;  %v113_v11 = vld [vmem:[%s470_s5 + $0x8] sm:$0xff]  ;;  %s259_s22 = sshll.u32 %s333_s21, 4  ;;  %s260_s22 = int_to_ptr.vmem [resolvable:$true] %s259_s22 }
   0x7   :  { %v214_v9 = vld [vmem:[%s466_s1] sm:$0xff]  ;;  %v115_v20 = vld [vmem:[%s470_s5 + $0x18] sm:$0xff]  ;;  %v114_v27 = vld [vmem:[%s470_s5 + $0x10] sm:$0xff] }
   0x8   :  { %v206_v12 = vld [vmem:[%s473_s8] sm:$0xf]  ;;  %133 = vperm.xlu2 %289, %v115_v20   ;;  %v111_v31 = vld [vmem:[%s469_s4 + $0x18] sm:$0xff]  ;;  %v109_v36 = vld [vmem:[%s469_s4 + $0x8] sm:$0xff] }
   0x9   :  { %v108_v30 = vld [vmem:[%s469_s4] sm:$0xff]  ;;  %v110_v37 = vld [vmem:[%s469_s4 + $0x10] sm:$0xff] }
   0xa   :  { %54 = vperm.xlu0 %287, %v40_v6   ;;  %v112_v34 = vld [vmem:[%s470_s5] sm:$0xff] }
   0xb   :  { %271 = vmatmul.msk.f32.gmra.mxu0 %vm62_vm0, %v35_v7  ;;  %v221_v38 = vld [vmem:[%s472_s7] sm:$0xff] }
   0xc   :  { %44 = vperm.xlu1 %288, %v38_v8   ;;  %v182_v54 = vld [vmem:[%s471_s6] sm:$0xf]  ;;  %s261_s6 = sshll.u32 %s474_s9, 4  ;;  %s262_s6 = int_to_ptr.hbm [resolvable:$true] %s261_s6 }
  0x10   :  { %128 = vperm.xlu2 %289, %v114_v27  }
  0x12   :  { %217 = vperm.xlu0 %287, %v214_v9  }
  0x13   :  { %272 = vmatmul.msk.f32.gmra.mxu0 %vm62_vm0, %v36_v10 }
  0x14   :  { %123 = vperm.xlu1 %288, %v113_v11  }
  0x18   :  { %118 = vperm.xlu2 %289, %v112_v34  }
  0x1a   :  { %209 = vperm.xlu0 %287, %v206_v12  }
  0x62   :  { %v134_v39 = vpop.permute.xlu2 %133 }
  0x6a   :  { %v129_v41 = vpop.permute.xlu2 %128 }
  0x72   :  { %v119_v47 = vpop.permute.xlu2 %118 }
  0x74   :  { %v60_v14 = vpop.permute.xlu0 %59 }
  0x76   :  { %v50_v15 = vpop.permute.xlu1 %49 }
  0x7c   :  { %v55_v19 = vpop.permute.xlu0 %54 }
  0x7e   :  { %v45_v21 = vpop.permute.xlu1 %44 }
  0x80   :  { %v92_v13 = vpop.f32.mrf.mxu0 }
  0x81   :  { %v93_v26 = vadd.f32 %v92_v13, %v45_v21 }
  0x84   :  { %v218_v33 = vpop.permute.xlu0 %217 }
  0x85   :  { %v220_v35 = vsub.f32 %v387_v0, %v218_v33 }
  0x86   :  { %v124_v46 = vpop.permute.xlu1 %123 }
  0x87   :  { %v101_v17 = vpop.f32.mrf.mxu2 }
  0x88   :  { %v95_v16 = vpop.f32.mrf.mxu0  ;;  %v102_v18 = vadd.f32 %v101_v17, %v60_v14 }
  0x89   :  { %v96_v23 = vadd.f32 %v95_v16, %v50_v15 }
  0x8a   :  { %290 = vtanh.f32 %v102_v18 }
  0x8c   :  { %v210_v63 = vpop.permute.xlu0 %209 }
  0x90   :  { %v98_v22 = vpop.f32.mrf.mxu0  ;;  %v291_v25 = vpop.eup %290 }
  0x91   :  { %v99_v24 = vadd.f32 %v98_v22, %v55_v19  ;;  %161 = vmatpush.msra.mxu1 %v291_v25  ;;  %281 = vmatpush.msra.mxu3 %v291_v25 }
  0x93   :  { %292 = vtanh.f32 %v99_v24 }
  0x94   :  { %294 = vtanh.f32 %v96_v23 }
  0x95   :  { %296 = vtanh.f32 %v93_v26 }
  0x99   :  { %v293_v28 = vpop.eup %292 }
  0x9a   :  { %162 = vmatpush.msra.mxu1 %v293_v28  ;;  %282 = vmatpush.msra.mxu3 %v293_v28  ;;  %v295_v29 = vpop.eup %294 }
  0x9b   :  { %v297_v32 = vpop.eup %296 }
  0x9c   :  { %163 = vmatpush.msra.mxu1 %v295_v29  ;;  %283 = vmatpush.msra.mxu3 %v295_v29 }
  0x9e   :  { %164 = vmatpush.msra.mxu1 %v297_v32  ;;  %284 = vmatpush.msra.mxu3 %v297_v32 }
  0x9f   :  { %274 = vmatmul.msk.f32.vlgmr.msra.gmra.mxu1 %vm136_vm1, %v108_v30  ;;  %277 = vmatmul.msk.f32.vlgmr.msra.gmra.mxu3 %vm136_vm1, %v111_v31 }
  0xa0   :  { %240 = vmatpush.msrb.mxu3 %v220_v35 }
  0xa7   :  { %275 = vmatmul.msk.f32.gmra.mxu1 %vm136_vm1, %v109_v36  ;;  %279 = vmatmul.msk.f32.vlgmr.msrb.gmra.mxu3 %vm62_vm0, %v221_v38 }
  0xaf   :  { %276 = vmatmul.msk.f32.gmra.mxu1 %vm136_vm1, %v110_v37 }
 0x11c   :  { %v166_v40 = vpop.f32.mrf.mxu1 }
 0x11d   :  { %v167_v51 = vadd.f32 %v166_v40, %v119_v47 }
 0x122   :  { %v175_v42 = vpop.f32.mrf.mxu3 }
 0x123   :  { %v176_v43 = vadd.f32 %v175_v42, %v134_v39 }
 0x124   :  { %v169_v44 = vpop.f32.mrf.mxu1 }
 0x125   :  { %298 = vtanh.f32 %v176_v43  ;;  %v170_v49 = vadd.f32 %v169_v44, %v124_v46 }
 0x12a   :  { %v242_v56 = vpop.f32.mrf.mxu3 }
 0x12b   :  { %v299_v45 = vpop.eup %298  ;;  %v245_v57 = vand.u32 2147483647, %v242_v56 }
 0x12c   :  { %v172_v48 = vpop.f32.mrf.mxu1  ;;  %198 = vmatpush.msrb.mxu2 %v299_v45 }
 0x12d   :  { %v173_v50 = vadd.f32 %v172_v48, %v129_v41  ;;  %v246_v58 = vrot.slane %v245_v57, 4 }
 0x12f   :  { %300 = vtanh.f32 %v173_v50  ;;  %v247_v59 = vadd.f32 %v246_v58, %v245_v57 }
 0x130   :  { %302 = vtanh.f32 %v170_v49 }
 0x131   :  { %304 = vtanh.f32 %v167_v51  ;;  %v248_v60 = vrot.slane %v247_v59, 2 }
 0x133   :  { %v249_v61 = vadd.f32 %v248_v60, %v247_v59 }
 0x135   :  { %v301_v52 = vpop.eup %300  ;;  %v250_v62 = vrot.slane %v249_v61, 1 }
 0x136   :  { %199 = vmatpush.msrb.mxu2 %v301_v52  ;;  %v303_v53 = vpop.eup %302 }
 0x137   :  { %v305_v55 = vpop.eup %304  ;;  %v251_v3 = vadd.f32 %v250_v62, %v249_v61 }
 0x138   :  { %200 = vmatpush.msrb.mxu2 %v303_v53 }
 0x13a   :  { %201 = vmatpush.msrb.mxu2 %v305_v55 }
 0x13b   :  { %278 = vmatmul.msk.f32.vlgmr.msrb.gmra.mxu2 %vm136_vm1, %v182_v54 }
 0x1be   :  { %v203_v0 = vpop.f32.mrf.mxu2 }
 0x1bf   :  { %v212_v1 = vsub.f32 %v203_v0, %v210_v63 }
 0x1c1   :  { %v213_v2 = vand.u32 2147483647, %v212_v1 }
 0x1c3   :  { %v252_v4 = vadd.f32 %v251_v3, %v213_v2 }
 0x1c5   :  { %253 = vst [vmem:[#allocation2] sm:$0xf] %v252_v4 }
 0x1c6   :  { %264 = dma.vmem_to_hbm [thread:$0]  %s260_s22, 64, %s262_s6, [#allocation3]  }
 0x1c7   :  { %330 = dma.done.wait [#allocation3], 64  }
 0x1c8   :  { %331 = vsyncadd [#allocation3], 4294967232 }
 0x1c9   :  { %269 = vsyncpa [#allocation3], 1 }

</bundles_post_ra>
